<compile_context>
chip_gen: v5e
topology: v5e:2x2
jax: 0.10.0
libtpu: 0.0.40
codegen_flags: <defaults>
</compile_context>

<pallas_src>
import jax
import jax.numpy as jnp
from jax.experimental import pallas as pl
from jax.experimental.pallas import tpu as pltpu


def _euler_step_kernel(dt_ref, x_ref, w_ref, b_ref, o_ref):
    # dt_ref: (1,) f32 in SMEM (scalar prefetch).  x_ref: (tm, D) row tile.
    # w_ref: (D, D) bf16, resident.  b_ref: (1, D) f32, resident.
    dt = dt_ref[0]
    # odefunc hot path: bf16-operand matmul on the MXU with f32 accumulation,
    # then bias + tanh (EUP) in f32.
    xw = jnp.dot(
        x_ref[...].astype(jnp.bfloat16),
        w_ref[...],
        preferred_element_type=jnp.float32,
    )
    f = jnp.tanh(xw + b_ref[...])
    # Explicit Euler step z = x + dt * f(t0, x).  Re-read x_ref here (instead
    # of holding an f32 copy live across the matmul) to keep vreg pressure low.
    o_ref[...] = (x_ref[...].astype(jnp.float32) + dt * f).astype(o_ref.dtype)


def _select_row_tile(N, D, itemsize):
    """Row-tile heuristic for the HBM-bound one-step Euler kernel."""
    # Cap tm so double-buffered x + z tiles stay <= ~16 MiB (v7x 64 MiB VMEM).
    vmem_cap = max(8, ((16 << 20) // (4 * D * itemsize)) // 8 * 8)
    if N < 1024:
        # Tiny problem: whole array as one block (per-step overhead dominates).
        return N if N <= vmem_cap else vmem_cap
    if N < 4096:
        tm = -(-N // 2)                       # two blocks -> both v7x TCs busy
    else:
        tm = min(4096, N // 4)                # >= 4 steps, ~0.5-2 MiB / block
    tm = -(-tm // 8) * 8                      # sublane-align; edge block masked
    return min(tm, vmem_cap)


def ode_block_forward(x, w, b, t, *, tm=None, out_dtype=None):
    """Pallas implementation of ODEblock.forward with a one-step Euler solve."""
    N, D = x.shape
    out_dtype = x.dtype if out_dtype is None else out_dtype
    if tm is None:
        tm = _select_row_tile(N, D, x.dtype.itemsize)
    n_blocks = pl.cdiv(N, tm)

    # Operand prep: bf16 weights for the MXU, f32 bias row, precomputed dt.
    w_bf16 = w.astype(jnp.bfloat16)
    b2d = b.reshape(1, D).astype(jnp.float32)
    dt = (t[1] - t[0]).astype(jnp.float32).reshape(1)

    # Resident (constant-index) operands: single-buffer them once W is big
    # enough that a second buffer would eat into v7x's 64 MiB VMEM budget.
    single_buffer = hasattr(pl, "Buffered") and (D * D * 2) >= (4 << 20)

    def _resident_spec(shape):
        idx_map = lambda i, dt_ref: tuple(0 for _ in shape)
        if single_buffer:
            return pl.BlockSpec(shape, idx_map, pipeline_mode=pl.Buffered(1))
        return pl.BlockSpec(shape, idx_map)

    cost = pl.CostEstimate(
        flops=2 * N * D * D,
        transcendentals=N * D,
        bytes_accessed=(N * D * (x.dtype.itemsize + jnp.dtype(out_dtype).itemsize)
                        + D * D * 2          # W (bf16)
                        + D * 4),            # bias
    )

    grid_spec = pltpu.PrefetchScalarGridSpec(
        num_scalar_prefetch=1,               # dt -> SMEM, first kernel arg
        grid=(n_blocks,),
        in_specs=[
            pl.BlockSpec((tm, D), lambda i, dt_ref: (i, 0)),   # x row tile
            _resident_spec((D, D)),                            # W (resident)
            _resident_spec((1, D)),                            # bias (resident)
        ],
        out_specs=pl.BlockSpec((tm, D), lambda i, dt_ref: (i, 0)),
    )

    return pl.pallas_call(
        _euler_step_kernel,
        out_shape=jax.ShapeDtypeStruct((N, D), out_dtype),
        grid_spec=grid_spec,
        compiler_params=pltpu.CompilerParams(
            dimension_semantics=("parallel",),
        ),
        cost_estimate=cost,
    )(dt, x, w_bf16, b2d)


def ode_block_reference_f32(x, w, b, t):
    """Pure-f32 reference of the module's forward pass (one Euler step)."""
    dt = (t[1] - t[0]).astype(jnp.float32)
    f = jnp.tanh(x.astype(jnp.float32) @ w.astype(jnp.float32) + b)
    return (x.astype(jnp.float32) + dt * f).astype(x.dtype)


def ode_block_reference_bf16(x, w, b, t):
    """Reference matching the kernel's numerics (bf16 matmul operands)."""
    dt = (t[1] - t[0]).astype(jnp.float32)
    xw = jnp.dot(x.astype(jnp.bfloat16), w.astype(jnp.bfloat16),
                 preferred_element_type=jnp.float32)
    f = jnp.tanh(xw + b)
    return (x.astype(jnp.float32) + dt * f).astype(x.dtype)


if __name__ == "__main__":
    key = jax.random.PRNGKey(0)
    kx, kw, kb = jax.random.split(key, 3)

    D = 128
    w = jax.random.normal(kw, (D, D), dtype=jnp.float32) * 0.1
    b = jax.random.normal(kb, (D,), dtype=jnp.float32) * 0.1
    t = jnp.array([0.0, 1.0], dtype=jnp.float32)     # self.t = tensor([0, 1])

    # N=300 : small, whole-array single block (block_shape equals array dims).
    # N=1100: two-block grid with a ragged, Pallas-masked edge block (no pad).
    for N in (300, 1100):
        x = jax.random.normal(kx, (N, D), dtype=jnp.float32)

        z = ode_block_forward(x, w, b, t)
        jax.block_until_ready(z)

        assert z.shape == x.shape and z.dtype == x.dtype
        # Tight check vs. a reference with identical (bf16-operand) numerics.
        z_ref_bf16 = ode_block_reference_bf16(x, w, b, t)
        assert jnp.allclose(z, z_ref_bf16, atol=1e-5, rtol=1e-5)
        # Loose check vs. the pure-f32 module semantics (bf16 operand rounding).
        z_ref_f32 = ode_block_reference_f32(x, w, b, t)
        assert jnp.allclose(z, z_ref_f32, atol=3e-2, rtol=3e-2)

    print("KERNEL_OK")
</pallas_src>

<mosaic_0001>
module attributes {stable_mosaic.version = 11 : i64} {
  func.func @_euler_step_kernel(%arg0: i32, %arg1: memref<1xf32, #tpu.memory_space<smem>>, %arg2: memref<300x128xf32, #tpu.memory_space<vmem>>, %arg3: memref<128x128xbf16, #tpu.memory_space<vmem>>, %arg4: memref<1x128xf32, #tpu.memory_space<vmem>>, %arg5: memref<300x128xf32, #tpu.memory_space<vmem>>) attributes {dimension_semantics = [#tpu.dimension_semantics<parallel>], iteration_bounds = array<i64: 1>, scalar_prefetch = 1 : i64, scratch_operands = 0 : i64, tpu.core_type = #tpu.core_type<tc>, window_params = [{transform_indices = @transform_0, window_bounds = array<i64: 300, 128>}, {pipeline_mode = #tpu.pipeline_mode<synchronous>, transform_indices = @transform_1, window_bounds = array<i64: 128, 128>}, {pipeline_mode = #tpu.pipeline_mode<synchronous>, transform_indices = @transform_2, window_bounds = array<i64: 1, 128>}, {transform_indices = @transform_3, window_bounds = array<i64: 300, 128>}]} {
    %c0 = arith.constant 0 : index
    %0 = memref.load %arg1[%c0] : memref<1xf32, #tpu.memory_space<smem>>
    %c0_0 = arith.constant 0 : index
    %c0_1 = arith.constant 0 : index
    %1 = vector.load %arg2[%c0_0, %c0_1] : memref<300x128xf32, #tpu.memory_space<vmem>>, vector<300x128xf32>
    %2 = arith.truncf %1 : vector<300x128xf32> to vector<300x128xbf16>
    %c0_2 = arith.constant 0 : index
    %c0_3 = arith.constant 0 : index
    %3 = vector.load %arg3[%c0_2, %c0_3] : memref<128x128xbf16, #tpu.memory_space<vmem>>, vector<128x128xbf16>
    %cst = arith.constant dense<0.000000e+00> : vector<300x128xf32>
    %4 = tpu.matmul %2, %3, %cst {dimension_numbers = #tpu.dot_dimension_numbers<[1], [0], [0], [1], [0, 0, 1, 1], [], []>} : vector<300x128xbf16>, vector<128x128xbf16>, vector<300x128xf32> -> vector<300x128xf32>
    %c0_4 = arith.constant 0 : index
    %c0_5 = arith.constant 0 : index
    %5 = vector.load %arg4[%c0_4, %c0_5] : memref<1x128xf32, #tpu.memory_space<vmem>>, vector<1x128xf32>
    %6 = vector.broadcast %5 : vector<1x128xf32> to vector<300x128xf32>
    %7 = arith.addf %4, %6 : vector<300x128xf32>
    %8 = math.tanh %7 : vector<300x128xf32>
    %c0_6 = arith.constant 0 : index
    %c0_7 = arith.constant 0 : index
    %9 = vector.load %arg2[%c0_6, %c0_7] : memref<300x128xf32, #tpu.memory_space<vmem>>, vector<300x128xf32>
    %10 = vector.broadcast %0 : f32 to vector<300x128xf32>
    %11 = arith.mulf %10, %8 : vector<300x128xf32>
    %12 = arith.addf %9, %11 : vector<300x128xf32>
    %c0_8 = arith.constant 0 : index
    %c0_9 = arith.constant 0 : index
    %13 = vector.load %arg5[%c0_8, %c0_9] : memref<300x128xf32, #tpu.memory_space<vmem>>, vector<300x128xf32>
    tpu.vector_store %arg5[%c0_8, %c0_9], %12 {strides = array<i32>} : memref<300x128xf32, #tpu.memory_space<vmem>>, vector<300x128xf32>,
    return
  }
  func.func @transform_0(%arg0: i32, %arg1: memref<1xf32, #tpu.memory_space<smem>>) -> (i32, i32) {
    %c0_i32 = arith.constant 0 : i32
    %c0_i32_0 = arith.constant 0 : i32
    return %arg0, %c0_i32 : i32, i32
  }
  func.func @transform_1(%arg0: i32, %arg1: memref<1xf32, #tpu.memory_space<smem>>) -> (i32, i32) {
    %c0_i32 = arith.constant 0 : i32
    %c0_i32_0 = arith.constant 0 : i32
    %c0_i32_1 = arith.constant 0 : i32
    return %c0_i32, %c0_i32_0 : i32, i32
  }
  func.func @transform_2(%arg0: i32, %arg1: memref<1xf32, #tpu.memory_space<smem>>) -> (i32, i32) {
    %c0_i32 = arith.constant 0 : i32
    %c0_i32_0 = arith.constant 0 : i32
    %c0_i32_1 = arith.constant 0 : i32
    return %c0_i32, %c0_i32_0 : i32, i32
  }
  func.func @transform_3(%arg0: i32, %arg1: memref<1xf32, #tpu.memory_space<smem>>) -> (i32, i32) {
    %c0_i32 = arith.constant 0 : i32
    %c0_i32_0 = arith.constant 0 : i32
    return %arg0, %c0_i32 : i32, i32
  }
}

</mosaic_0001>

<bundles_post_ra>
// kernel: tpu_custom_call.1
= control target key start
LH: loop header
LB: loop body
LE: loop exit
PB: predicated region body
PF: predicated region fallthrough
CT: control target
= control target key end

     0   :  { %10 = vsyncpa [#allocation5], 0  ;;  %s963_s0 = inlined_call_operand.<no memory space> [shape: f32[1], index: 0, kind: input, shape index: {}]   ;;  %s964_s1 = inlined_call_operand.hbm [shape: f32[300,128], index: 1, kind: input, shape index: {}]   ;;  %s965_s2 = inlined_call_operand.hbm [shape: bf16[128,128], index: 2, kind: input, shape index: {}]   ;;  %s966_s3 = inlined_call_operand.vmem [shape: f32[1,128], index: 3, kind: input, shape index: {}]   ;;  %s967_s4 = inlined_call_operand.hbm [shape: f32[300,128], index: 4, kind: output, shape index: {}]  }
   0x1   :  { %11 = vsyncpa [#allocation8], 0 }
   0x2   :  { %12 = vsyncpa [#allocation6], 0  ;;  %s17_s17 = sshll.u32 %s964_s1, 4  ;;  %s678_s18 = smov [#allocation4]   ;;  %s18_s17 = int_to_ptr.hbm [resolvable:$true] %s17_s17 }
   0x3   :  { %s19_s19 = sshll.u32 %s678_s18, 4  ;;  %s30_s22 = sshll.u32 %s965_s2, 4  ;;  %s20_s19 = int_to_ptr.vmem [resolvable:$true] %s19_s19  ;;  %s31_s22 = int_to_ptr.hbm [resolvable:$true] %s30_s22 }
   0x4   :  { %s679_s23 = smov 128   ;;  %s680_s24 = smov 8  }
   0x5   :  { %25 = dma.hbm_to_vmem [thread:$0]  %s18_s17, 4864, %s20_s19, [#allocation5], %s679_s23, %s679_s23, %s680_s24  }
   0x6   :  { %s681_s25 = smov [#allocation7]   ;;  %s682_s27 = smov 64  }
   0x7   :  { %s32_s26 = sshll.u32 %s681_s25, 4  ;;  %s683_s1 = smov 4   ;;  %s33_s26 = int_to_ptr.vmem [resolvable:$true] %s32_s26 }
   0x8   :  { %38 = dma.hbm_to_vmem [thread:$0]  %s31_s22, 1024, %s33_s26, [#allocation8], %s682_s27, %s682_s27, %s683_s1  }
   0x9   :  { %672 = dma.done.wait [#allocation5], 4864  }
   0xa   :  { %673 = vsyncadd [#allocation5], 4294962432 }
   0xb   :  { %674 = dma.done.wait [#allocation8], 1024  }
   0xc   :  { %675 = vsyncadd [#allocation8], 4294966272  ;;  %v491_v0 = vld [vmem:[#allocation7 + $0x38] sm:$0xff]  ;;  %v490_v1 = vld [vmem:[#allocation7 + $0x30] sm:$0xff]  ;;  %s438_s7 = sshll.u32 %s967_s4, 4  ;;  %s439_s7 = int_to_ptr.hbm [resolvable:$true] %s438_s7 }
   0xd   :  { %492 = vmatpush.bf16.msra.mxu1 %v491_v0  ;;  %493 = vmatpush.bf16.msra.mxu2 %v491_v0  ;;  %v489_v2 = vld [vmem:[#allocation7 + $0x28] sm:$0xff]  ;;  %v488_v3 = vld [vmem:[#allocation7 + $0x20] sm:$0xff]  ;;  %v487_v4 = vld [vmem:[#allocation7 + $0x18] sm:$0xff] }
   0xe   :  { %494 = vmatpush.bf16.msra.mxu3 %v491_v0  ;;  %175 = vmatpush.bf16.msra.mxu0 %v491_v0  ;;  %v486_v5 = vld [vmem:[#allocation7 + $0x10] sm:$0xff]  ;;  %v485_v6 = vld [vmem:[#allocation7 + $0x8] sm:$0xff]  ;;  %v484_v7 = vld [vmem:[#allocation7] sm:$0xff] }
   0xf   :  { %v719_v8 = vld [vmem:[#allocation4 + $0x40] sm:$0xff]  ;;  %v721_v9 = vld [vmem:[#allocation4 + $0x48] sm:$0xff]  ;;  %v723_v10 = vld [vmem:[#allocation4 + $0x90] sm:$0xff] }
  0x10   :  { %v725_v11 = vld [vmem:[#allocation4 + $0x98] sm:$0xff]  ;;  %v727_v12 = vld [vmem:[#allocation4 + $0xe0] sm:$0xff]  ;;  %v729_v13 = vld [vmem:[#allocation4 + $0xe8] sm:$0xff]  ;;  %v92_v16 = vpack.c.bf16 %v721_v9, %v719_v8 }
  0x11   :  { %495 = vmatpush.bf16.msra.mxu1 %v490_v1  ;;  %496 = vmatpush.bf16.msra.mxu2 %v490_v1  ;;  %v731_v14 = vld [vmem:[#allocation4] sm:$0xff]  ;;  %v733_v15 = vld [vmem:[#allocation4 + $0x8] sm:$0xff]  ;;  %v97_v17 = vpack.c.bf16 %v725_v11, %v723_v10  ;;  %v102_v18 = vpack.c.bf16 %v729_v13, %v727_v12  ;;  %v743_v20 = vld [vmem:[#allocation4 + $0x50] sm:$0xff] }
  0x12   :  { %497 = vmatpush.bf16.msra.mxu3 %v490_v1  ;;  %176 = vmatpush.bf16.msra.mxu0 %v490_v1  ;;  %v88_v19 = vpack.c.bf16 %v733_v15, %v731_v14  ;;  %v745_v21 = vld [vmem:[#allocation4 + $0x58] sm:$0xff]  ;;  %v747_v22 = vld [vmem:[#allocation4 + $0xa0] sm:$0xff]  ;;  %v749_v23 = vld [vmem:[#allocation4 + $0xa8] sm:$0xff] }
  0x13   :  { %v751_v24 = vld [vmem:[#allocation4 + $0xf0] sm:$0xff]  ;;  %v753_v25 = vld [vmem:[#allocation4 + $0xf8] sm:$0xff]  ;;  %v93_v28 = vpack.c.bf16 %v745_v21, %v743_v20  ;;  %v98_v29 = vpack.c.bf16 %v749_v23, %v747_v22  ;;  %v767_v32 = vld [vmem:[#allocation4 + $0x60] sm:$0xff] }
  0x14   :  { %v755_v26 = vld [vmem:[#allocation4 + $0x10] sm:$0xff]  ;;  %v757_v27 = vld [vmem:[#allocation4 + $0x18] sm:$0xff]  ;;  %v103_v30 = vpack.c.bf16 %v753_v25, %v751_v24  ;;  %v769_v33 = vld [vmem:[#allocation4 + $0x68] sm:$0xff] }
  0x15   :  { %498 = vmatpush.bf16.msra.mxu1 %v489_v2  ;;  %499 = vmatpush.bf16.msra.mxu2 %v489_v2  ;;  %v89_v31 = vpack.c.bf16 %v757_v27, %v755_v26  ;;  %v771_v34 = vld [vmem:[#allocation4 + $0xb0] sm:$0xff]  ;;  %v773_v35 = vld [vmem:[#allocation4 + $0xb8] sm:$0xff]  ;;  %v775_v36 = vld [vmem:[#allocation4 + $0x100] sm:$0xff]  ;;  %v94_v40 = vpack.c.bf16 %v769_v33, %v767_v32 }
  0x16   :  { %500 = vmatpush.bf16.msra.mxu3 %v489_v2  ;;  %177 = vmatpush.bf16.msra.mxu0 %v489_v2  ;;  %v777_v37 = vld [vmem:[#allocation4 + $0x108] sm:$0xff]  ;;  %v779_v38 = vld [vmem:[#allocation4 + $0x20] sm:$0xff]  ;;  %v99_v41 = vpack.c.bf16 %v773_v35, %v771_v34  ;;  %v791_v44 = vld [vmem:[#allocation4 + $0x70] sm:$0xff] }
  0x17   :  { %v781_v39 = vld [vmem:[#allocation4 + $0x28] sm:$0xff]  ;;  %v104_v42 = vpack.c.bf16 %v777_v37, %v775_v36  ;;  %v793_v45 = vld [vmem:[#allocation4 + $0x78] sm:$0xff]  ;;  %v795_v46 = vld [vmem:[#allocation4 + $0xc0] sm:$0xff] }
  0x18   :  { %v90_v43 = vpack.c.bf16 %v781_v39, %v779_v38  ;;  %v797_v47 = vld [vmem:[#allocation4 + $0xc8] sm:$0xff]  ;;  %v799_v48 = vld [vmem:[#allocation4 + $0x110] sm:$0xff]  ;;  %v801_v49 = vld [vmem:[#allocation4 + $0x118] sm:$0xff]  ;;  %v95_v52 = vpack.c.bf16 %v793_v45, %v791_v44 }
  0x19   :  { %501 = vmatpush.bf16.msra.mxu1 %v488_v3  ;;  %502 = vmatpush.bf16.msra.mxu2 %v488_v3  ;;  %v803_v50 = vld [vmem:[#allocation4 + $0x30] sm:$0xff]  ;;  %v805_v51 = vld [vmem:[#allocation4 + $0x38] sm:$0xff]  ;;  %v100_v53 = vpack.c.bf16 %v797_v47, %v795_v46  ;;  %v105_v54 = vpack.c.bf16 %v801_v49, %v799_v48  ;;  %v815_v56 = vld [vmem:[#allocation4 + $0x80] sm:$0xff] }
  0x1a   :  { %503 = vmatpush.bf16.msra.mxu3 %v488_v3  ;;  %178 = vmatpush.bf16.msra.mxu0 %v488_v3  ;;  %v91_v55 = vpack.c.bf16 %v805_v51, %v803_v50  ;;  %v817_v57 = vld [vmem:[#allocation4 + $0x88] sm:$0xff]  ;;  %v819_v58 = vld [vmem:[#allocation4 + $0xd0] sm:$0xff]  ;;  %v821_v59 = vld [vmem:[#allocation4 + $0xd8] sm:$0xff] }
  0x1b   :  { %v823_v60 = vld [vmem:[#allocation4 + $0x120] sm:$0xff]  ;;  %v825_v61 = vld [vmem:[#allocation4 + $0x128] sm:$0xf]  ;;  %v96_v62 = vpack.c.bf16 %v817_v57, %v815_v56  ;;  %v101_v63 = vpack.c.bf16 %v821_v59, %v819_v58 }
  0x1c   :  { %v106_v0 = vpack.c.bf16 %v825_v61, %v823_v60  ;;  %v836_v1 = vld [vmem:[%s966_s3] ss:$0 sm:$0xff] }
  0x1d   :  { %504 = vmatpush.bf16.msra.mxu1 %v487_v4  ;;  %505 = vmatpush.bf16.msra.mxu2 %v487_v4 }
  0x1e   :  { %506 = vmatpush.bf16.msra.mxu3 %v487_v4  ;;  %179 = vmatpush.bf16.msra.mxu0 %v487_v4 }
  0x21   :  { %507 = vmatpush.bf16.msra.mxu1 %v486_v5  ;;  %508 = vmatpush.bf16.msra.mxu2 %v486_v5 }
  0x22   :  { %509 = vmatpush.bf16.msra.mxu3 %v486_v5  ;;  %180 = vmatpush.bf16.msra.mxu0 %v486_v5 }
  0x25   :  { %510 = vmatpush.bf16.msra.mxu1 %v485_v6  ;;  %511 = vmatpush.bf16.msra.mxu2 %v485_v6 }
  0x26   :  { %512 = vmatpush.bf16.msra.mxu3 %v485_v6  ;;  %181 = vmatpush.bf16.msra.mxu0 %v485_v6 }
  0x29   :  { %513 = vmatpush.bf16.msra.mxu1 %v484_v7  ;;  %514 = vmatpush.bf16.msra.mxu2 %v484_v7 }
  0x2a   :  { %515 = vmatpush.bf16.msra.mxu3 %v484_v7  ;;  %182 = vmatpush.bf16.msra.mxu0 %v484_v7  ;;  %v843_v7 = vstv %s963_s0  ;;  %s684_s0 = smov [#allocation9]  }
  0x2b   :  { %s436_s3 = sshll.u32 %s684_s0, 4  ;;  %s437_s3 = int_to_ptr.vmem [resolvable:$true] %s436_s3 }
  0x2c   :  { %203 = vmatmul.bf16.vlgmr.msra.gmra.mxu1 %v92_v16  ;;  %228 = vmatmul.bf16.vlgmr.msra.gmra.mxu2 %v97_v17 }
  0x2d   :  { %253 = vmatmul.bf16.vlgmr.msra.gmra.mxu3 %v102_v18  ;;  %183 = vmatmul.bf16.vlgmr.msra.gmra.mxu0 %v88_v19 }
  0x3c   :  { %208 = vmatmul.bf16.gmra.mxu1 %v93_v28  ;;  %233 = vmatmul.bf16.gmra.mxu2 %v98_v29 }
  0x3d   :  { %258 = vmatmul.bf16.gmra.mxu3 %v103_v30  ;;  %188 = vmatmul.bf16.gmra.mxu0 %v89_v31 }
  0x4c   :  { %213 = vmatmul.bf16.gmra.mxu1 %v94_v40  ;;  %238 = vmatmul.bf16.gmra.mxu2 %v99_v41 }
  0x4d   :  { %263 = vmatmul.bf16.gmra.mxu3 %v104_v42  ;;  %193 = vmatmul.bf16.gmra.mxu0 %v90_v43 }
  0x5c   :  { %218 = vmatmul.bf16.gmra.mxu1 %v95_v52  ;;  %243 = vmatmul.bf16.gmra.mxu2 %v100_v53 }
  0x5d   :  { %268 = vmatmul.bf16.gmra.mxu3 %v105_v54  ;;  %198 = vmatmul.bf16.gmra.mxu0 %v91_v55 }
  0x6c   :  { %223 = vmatmul.bf16.gmra.mxu1 %v96_v62  ;;  %248 = vmatmul.bf16.gmra.mxu2 %v101_v63 }
  0x6d   :  { %273 = vmatmul.bf16.gmra.mxu3 %v106_v0 }
  0xa9   :  { %v204_v2 = vpop.f32.mrf.mxu1 }
  0xaa   :  { %v205_v3 = vadd.f32 %v836_v1, %v204_v2  ;;  %v184_v4 = vpop.f32.mrf.mxu0 }
  0xab   :  { %v185_v5 = vadd.f32 %v836_v1, %v184_v4 }
  0xac   :  { %524 = vtanh.f32 %v205_v3 }
  0xad   :  { %526 = vtanh.f32 %v185_v5 }
  0xaf   :  { %v229_v6 = vpop.f32.mrf.mxu2 }
  0xb0   :  { %v230_v16 = vadd.f32 %v836_v1, %v229_v6  ;;  %v254_v17 = vpop.f32.mrf.mxu3 }
  0xb1   :  { %v255_v18 = vadd.f32 %v836_v1, %v254_v17  ;;  %v206_v19 = vpop.f32.mrf.mxu1 }
  0xb2   :  { %v525_v28 = vpop.eup %524  ;;  %528 = vtanh.f32 %v230_v16  ;;  %v207_v29 = vadd.f32 %v836_v1, %v206_v19  ;;  %v186_v30 = vpop.f32.mrf.mxu0 }
  0xb3   :  { %v527_v31 = vpop.eup %526  ;;  %v326_v40 = vmul.f32 %v525_v28, %v843_v7  ;;  %530 = vtanh.f32 %v255_v18  ;;  %v187_v41 = vadd.f32 %v836_v1, %v186_v30 }
  0xb4   :  { %532 = vtanh.f32 %v207_v29  ;;  %v318_v42 = vmul.f32 %v527_v31, %v843_v7 }
  0xb5   :  { %v364_v43 = vadd.f32 %v326_v40, %v719_v8  ;;  %534 = vtanh.f32 %v187_v41 }
  0xb6   :  { %v356_v52 = vadd.f32 %v318_v42, %v731_v14 }
  0xb7   :  { %402 = vst [vmem:[#allocation9 + $0x40] sm:$0xff] %v364_v43  ;;  %v231_v53 = vpop.f32.mrf.mxu2 }
  0xb8   :  { %v529_v54 = vpop.eup %528  ;;  %394 = vst [vmem:[#allocation9] sm:$0xff] %v356_v52  ;;  %v232_v55 = vadd.f32 %v836_v1, %v231_v53  ;;  %v256_v62 = vpop.f32.mrf.mxu3 }
  0xb9   :  { %v531_v63 = vpop.eup %530  ;;  %v336_v0 = vmul.f32 %v529_v54, %v843_v7  ;;  %v257_v2 = vadd.f32 %v836_v1, %v256_v62  ;;  %v209_v3 = vpop.f32.mrf.mxu1 }
  0xba   :  { %v533_v4 = vpop.eup %532  ;;  %v346_v5 = vmul.f32 %v531_v63, %v843_v7  ;;  %536 = vtanh.f32 %v232_v55  ;;  %v210_v8 = vadd.f32 %v836_v1, %v209_v3  ;;  %v189_v14 = vpop.f32.mrf.mxu0 }
  0xbb   :  { %v535_v6 = vpop.eup %534  ;;  %v374_v16 = vadd.f32 %v336_v0, %v723_v10  ;;  %v327_v17 = vmul.f32 %v533_v4, %v843_v7  ;;  %538 = vtanh.f32 %v257_v2  ;;  %v190_v18 = vadd.f32 %v836_v1, %v189_v14 }
  0xbc   :  { %v384_v19 = vadd.f32 %v346_v5, %v727_v12  ;;  %540 = vtanh.f32 %v210_v8  ;;  %v319_v28 = vmul.f32 %v535_v6, %v843_v7 }
  0xbd   :  { %412 = vst [vmem:[#allocation9 + $0x90] sm:$0xff] %v374_v16  ;;  %v365_v29 = vadd.f32 %v327_v17, %v721_v9  ;;  %542 = vtanh.f32 %v190_v18 }
  0xbe   :  { %422 = vst [vmem:[#allocation9 + $0xe0] sm:$0xff] %v384_v19  ;;  %v357_v30 = vadd.f32 %v319_v28, %v733_v15 }
  0xbf   :  { %403 = vst [vmem:[#allocation9 + $0x48] sm:$0xff] %v365_v29  ;;  %v234_v31 = vpop.f32.mrf.mxu2 }
  0xc0   :  { %v537_v10 = vpop.eup %536  ;;  %395 = vst [vmem:[#allocation9 + $0x8] sm:$0xff] %v357_v30  ;;  %v235_v40 = vadd.f32 %v836_v1, %v234_v31  ;;  %v259_v41 = vpop.f32.mrf.mxu3 }
  0xc1   :  { %v539_v42 = vpop.eup %538  ;;  %v337_v12 = vmul.f32 %v537_v10, %v843_v7  ;;  %v260_v43 = vadd.f32 %v836_v1, %v259_v41  ;;  %v211_v52 = vpop.f32.mrf.mxu1 }
  0xc2   :  { %v541_v53 = vpop.eup %540  ;;  %v347_v9 = vmul.f32 %v539_v42, %v843_v7  ;;  %544 = vtanh.f32 %v235_v40  ;;  %v212_v54 = vadd.f32 %v836_v1, %v211_v52  ;;  %v191_v15 = vpop.f32.mrf.mxu0 }
  0xc3   :  { %v543_v55 = vpop.eup %542  ;;  %v375_v62 = vadd.f32 %v337_v12, %v725_v11  ;;  %v328_v63 = vmul.f32 %v541_v53, %v843_v7  ;;  %546 = vtanh.f32 %v260_v43  ;;  %v192_v0 = vadd.f32 %v836_v1, %v191_v15 }
  0xc4   :  { %v385_v2 = vadd.f32 %v347_v9, %v729_v13  ;;  %548 = vtanh.f32 %v212_v54  ;;  %v320_v3 = vmul.f32 %v543_v55, %v843_v7 }
  0xc5   :  { %413 = vst [vmem:[#allocation9 + $0x98] sm:$0xff] %v375_v62  ;;  %v366_v4 = vadd.f32 %v328_v63, %v743_v20  ;;  %550 = vtanh.f32 %v192_v0 }
  0xc6   :  { %423 = vst [vmem:[#allocation9 + $0xe8] sm:$0xff] %v385_v2  ;;  %v358_v5 = vadd.f32 %v320_v3, %v755_v26 }
  0xc7   :  { %404 = vst [vmem:[#allocation9 + $0x50] sm:$0xff] %v366_v4  ;;  %v236_v8 = vpop.f32.mrf.mxu2 }
  0xc8   :  { %v545_v11 = vpop.eup %544  ;;  %396 = vst [vmem:[#allocation9 + $0x10] sm:$0xff] %v358_v5  ;;  %v237_v14 = vadd.f32 %v836_v1, %v236_v8  ;;  %v261_v6 = vpop.f32.mrf.mxu3 }
  0xc9   :  { %v547_v16 = vpop.eup %546  ;;  %v338_v13 = vmul.f32 %v545_v11, %v843_v7  ;;  %v262_v17 = vadd.f32 %v836_v1, %v261_v6  ;;  %v214_v18 = vpop.f32.mrf.mxu1 }
  0xca   :  { %v549_v19 = vpop.eup %548  ;;  %v348_v20 = vmul.f32 %v547_v16, %v843_v7  ;;  %552 = vtanh.f32 %v237_v14  ;;  %v215_v28 = vadd.f32 %v836_v1, %v214_v18  ;;  %v194_v26 = vpop.f32.mrf.mxu0 }
  0xcb   :  { %v551_v29 = vpop.eup %550  ;;  %v376_v30 = vadd.f32 %v338_v13, %v747_v22  ;;  %v329_v31 = vmul.f32 %v549_v19, %v843_v7  ;;  %554 = vtanh.f32 %v262_v17  ;;  %v195_v10 = vadd.f32 %v836_v1, %v194_v26 }
  0xcc   :  { %v386_v40 = vadd.f32 %v348_v20, %v751_v24  ;;  %556 = vtanh.f32 %v215_v28  ;;  %v321_v41 = vmul.f32 %v551_v29, %v843_v7 }
  0xcd   :  { %414 = vst [vmem:[#allocation9 + $0xa0] sm:$0xff] %v376_v30  ;;  %v367_v42 = vadd.f32 %v329_v31, %v745_v21  ;;  %558 = vtanh.f32 %v195_v10 }
  0xce   :  { %424 = vst [vmem:[#allocation9 + $0xf0] sm:$0xff] %v386_v40  ;;  %v359_v12 = vadd.f32 %v321_v41, %v757_v27 }
  0xcf   :  { %405 = vst [vmem:[#allocation9 + $0x58] sm:$0xff] %v367_v42  ;;  %v239_v43 = vpop.f32.mrf.mxu2 }
  0xd0   :  { %v553_v22 = vpop.eup %552  ;;  %397 = vst [vmem:[#allocation9 + $0x18] sm:$0xff] %v359_v12  ;;  %v240_v52 = vadd.f32 %v836_v1, %v239_v43  ;;  %v264_v53 = vpop.f32.mrf.mxu3 }
  0xd1   :  { %v555_v9 = vpop.eup %554  ;;  %v339_v24 = vmul.f32 %v553_v22, %v843_v7  ;;  %v265_v54 = vadd.f32 %v836_v1, %v264_v53  ;;  %v216_v15 = vpop.f32.mrf.mxu1 }
  0xd2   :  { %v557_v55 = vpop.eup %556  ;;  %v349_v21 = vmul.f32 %v555_v9, %v843_v7  ;;  %560 = vtanh.f32 %v240_v52  ;;  %v217_v62 = vadd.f32 %v836_v1, %v216_v15  ;;  %v196_v27 = vpop.f32.mrf.mxu0 }
  0xd3   :  { %v559_v63 = vpop.eup %558  ;;  %v377_v0 = vadd.f32 %v339_v24, %v749_v23  ;;  %v330_v2 = vmul.f32 %v557_v55, %v843_v7  ;;  %562 = vtanh.f32 %v265_v54  ;;  %v197_v3 = vadd.f32 %v836_v1, %v196_v27 }
  0xd4   :  { %v387_v4 = vadd.f32 %v349_v21, %v753_v25  ;;  %564 = vtanh.f32 %v217_v62  ;;  %v322_v5 = vmul.f32 %v559_v63, %v843_v7 }
  0xd5   :  { %415 = vst [vmem:[#allocation9 + $0xa8] sm:$0xff] %v377_v0  ;;  %v368_v8 = vadd.f32 %v330_v2, %v767_v32  ;;  %566 = vtanh.f32 %v197_v3 }
  0xd6   :  { %425 = vst [vmem:[#allocation9 + $0xf8] sm:$0xff] %v387_v4  ;;  %v360_v11 = vadd.f32 %v322_v5, %v779_v38 }
  0xd7   :  { %406 = vst [vmem:[#allocation9 + $0x60] sm:$0xff] %v368_v8  ;;  %v241_v14 = vpop.f32.mrf.mxu2 }
  0xd8   :  { %v561_v23 = vpop.eup %560  ;;  %398 = vst [vmem:[#allocation9 + $0x20] sm:$0xff] %v360_v11  ;;  %v242_v6 = vadd.f32 %v836_v1, %v241_v14  ;;  %v266_v16 = vpop.f32.mrf.mxu3 }
  0xd9   :  { %v563_v13 = vpop.eup %562  ;;  %v340_v25 = vmul.f32 %v561_v23, %v843_v7  ;;  %v267_v17 = vadd.f32 %v836_v1, %v266_v16  ;;  %v219_v18 = vpop.f32.mrf.mxu1 }
  0xda   :  { %v565_v19 = vpop.eup %564  ;;  %v350_v32 = vmul.f32 %v563_v13, %v843_v7  ;;  %568 = vtanh.f32 %v242_v6  ;;  %v220_v20 = vadd.f32 %v836_v1, %v219_v18  ;;  %v199_v38 = vpop.f32.mrf.mxu0 }
  0xdb   :  { %v567_v28 = vpop.eup %566  ;;  %v378_v26 = vadd.f32 %v340_v25, %v771_v34  ;;  %v331_v29 = vmul.f32 %v565_v19, %v843_v7  ;;  %570 = vtanh.f32 %v267_v17  ;;  %v200_v30 = vadd.f32 %v836_v1, %v199_v38 }
  0xdc   :  { %v388_v31 = vadd.f32 %v350_v32, %v775_v36  ;;  %572 = vtanh.f32 %v220_v20  ;;  %v323_v10 = vmul.f32 %v567_v28, %v843_v7 }
  0xdd   :  { %416 = vst [vmem:[#allocation9 + $0xb0] sm:$0xff] %v378_v26  ;;  %v369_v40 = vadd.f32 %v331_v29, %v769_v33  ;;  %574 = vtanh.f32 %v200_v30 }
  0xde   :  { %426 = vst [vmem:[#allocation9 + $0x100] sm:$0xff] %v388_v31  ;;  %v361_v41 = vadd.f32 %v323_v10, %v781_v39 }
  0xdf   :  { %407 = vst [vmem:[#allocation9 + $0x68] sm:$0xff] %v369_v40  ;;  %v244_v42 = vpop.f32.mrf.mxu2 }
  0xe0   :  { %v569_v34 = vpop.eup %568  ;;  %399 = vst [vmem:[#allocation9 + $0x28] sm:$0xff] %v361_v41  ;;  %v245_v12 = vadd.f32 %v836_v1, %v244_v42  ;;  %v269_v43 = vpop.f32.mrf.mxu3 }
  0xe1   :  { %v571_v22 = vpop.eup %570  ;;  %v341_v36 = vmul.f32 %v569_v34, %v843_v7  ;;  %v270_v52 = vadd.f32 %v836_v1, %v269_v43  ;;  %v221_v53 = vpop.f32.mrf.mxu1 }
  0xe2   :  { %v573_v9 = vpop.eup %572  ;;  %v351_v33 = vmul.f32 %v571_v22, %v843_v7  ;;  %576 = vtanh.f32 %v245_v12  ;;  %v222_v24 = vadd.f32 %v836_v1, %v221_v53  ;;  %v201_v39 = vpop.f32.mrf.mxu0 }
  0xe3   :  { %v575_v54 = vpop.eup %574  ;;  %v379_v15 = vadd.f32 %v341_v36, %v773_v35  ;;  %v332_v55 = vmul.f32 %v573_v9, %v843_v7  ;;  %578 = vtanh.f32 %v270_v52  ;;  %v202_v21 = vadd.f32 %v836_v1, %v201_v39 }
  0xe4   :  { %v389_v62 = vadd.f32 %v351_v33, %v777_v37  ;;  %580 = vtanh.f32 %v222_v24  ;;  %v324_v27 = vmul.f32 %v575_v54, %v843_v7 }
  0xe5   :  { %417 = vst [vmem:[#allocation9 + $0xb8] sm:$0xff] %v379_v15  ;;  %v370_v63 = vadd.f32 %v332_v55, %v791_v44  ;;  %582 = vtanh.f32 %v202_v21 }
  0xe6   :  { %427 = vst [vmem:[#allocation9 + $0x108] sm:$0xff] %v389_v62  ;;  %v362_v0 = vadd.f32 %v324_v27, %v803_v50 }
  0xe7   :  { %408 = vst [vmem:[#allocation9 + $0x70] sm:$0xff] %v370_v63  ;;  %v246_v2 = vpop.f32.mrf.mxu2 }
  0xe8   :  { %v577_v35 = vpop.eup %576  ;;  %400 = vst [vmem:[#allocation9 + $0x30] sm:$0xff] %v362_v0  ;;  %v247_v3 = vadd.f32 %v836_v1, %v246_v2  ;;  %v271_v4 = vpop.f32.mrf.mxu3 }
  0xe9   :  { %v579_v5 = vpop.eup %578  ;;  %v342_v37 = vmul.f32 %v577_v35, %v843_v7  ;;  %v272_v8 = vadd.f32 %v836_v1, %v271_v4  ;;  %v224_v11 = vpop.f32.mrf.mxu1 }
  0xea   :  { %v581_v14 = vpop.eup %580  ;;  %v352_v44 = vmul.f32 %v579_v5, %v843_v7  ;;  %584 = vtanh.f32 %v247_v3  ;;  %v225_v23 = vadd.f32 %v836_v1, %v224_v11 }
  0xeb   :  { %v583_v50 = vpop.eup %582  ;;  %v380_v6 = vadd.f32 %v342_v37, %v795_v46  ;;  %v333_v16 = vmul.f32 %v581_v14, %v843_v7  ;;  %586 = vtanh.f32 %v272_v8 }
  0xec   :  { %v390_v13 = vadd.f32 %v352_v44, %v799_v48  ;;  %588 = vtanh.f32 %v225_v23  ;;  %v325_v25 = vmul.f32 %v583_v50, %v843_v7 }
  0xed   :  { %418 = vst [vmem:[#allocation9 + $0xc0] sm:$0xff] %v380_v6  ;;  %v371_v17 = vadd.f32 %v333_v16, %v793_v45 }
  0xee   :  { %428 = vst [vmem:[#allocation9 + $0x110] sm:$0xff] %v390_v13  ;;  %v363_v18 = vadd.f32 %v325_v25, %v805_v51 }
  0xef   :  { %409 = vst [vmem:[#allocation9 + $0x78] sm:$0xff] %v371_v17  ;;  %v249_v19 = vpop.f32.mrf.mxu2 }
  0xf0   :  { %v585_v32 = vpop.eup %584  ;;  %401 = vst [vmem:[#allocation9 + $0x38] sm:$0xff] %v363_v18  ;;  %v250_v46 = vadd.f32 %v836_v1, %v249_v19  ;;  %v274_v20 = vpop.f32.mrf.mxu3 }
  0xf1   :  { %v587_v38 = vpop.eup %586  ;;  %v343_v28 = vmul.f32 %v585_v32, %v843_v7  ;;  %v275_v48 = vadd.f32 %v836_v1, %v274_v20  ;;  %v226_v26 = vpop.f32.mrf.mxu1 }
  0xf2   :  { %v589_v29 = vpop.eup %588  ;;  %v353_v30 = vmul.f32 %v587_v38, %v843_v7  ;;  %590 = vtanh.f32 %v250_v46  ;;  %v227_v45 = vadd.f32 %v836_v1, %v226_v26 }
  0xf3   :  { %v381_v51 = vadd.f32 %v343_v28, %v797_v47  ;;  %v334_v31 = vmul.f32 %v589_v29, %v843_v7  ;;  %592 = vtanh.f32 %v275_v48 }
  0xf4   :  { %v391_v10 = vadd.f32 %v353_v30, %v801_v49  ;;  %594 = vtanh.f32 %v227_v45 }
  0xf5   :  { %419 = vst [vmem:[#allocation9 + $0xc8] sm:$0xff] %v381_v51  ;;  %v372_v40 = vadd.f32 %v334_v31, %v815_v56 }
  0xf6   :  { %429 = vst [vmem:[#allocation9 + $0x118] sm:$0xff] %v391_v10 }
  0xf7   :  { %410 = vst [vmem:[#allocation9 + $0x80] sm:$0xff] %v372_v40  ;;  %v251_v41 = vpop.f32.mrf.mxu2 }
  0xf8   :  { %v591_v42 = vpop.eup %590  ;;  %v252_v34 = vadd.f32 %v836_v1, %v251_v41  ;;  %v276_v12 = vpop.f32.mrf.mxu3 }
  0xf9   :  { %v593_v43 = vpop.eup %592  ;;  %v344_v22 = vmul.f32 %v591_v42, %v843_v7  ;;  %v277_v47 = vadd.f32 %v836_v1, %v276_v12 }
  0xfa   :  { %v595_v36 = vpop.eup %594  ;;  %v354_v52 = vmul.f32 %v593_v43, %v843_v7  ;;  %596 = vtanh.f32 %v252_v34 }
  0xfb   :  { %v382_v49 = vadd.f32 %v344_v22, %v819_v58  ;;  %v335_v56 = vmul.f32 %v595_v36, %v843_v7  ;;  %598 = vtanh.f32 %v277_v47 }
  0xfc   :  { %v392_v53 = vadd.f32 %v354_v52, %v823_v60 }
  0xfd   :  { %420 = vst [vmem:[#allocation9 + $0xd0] sm:$0xff] %v382_v49  ;;  %v373_v9 = vadd.f32 %v335_v56, %v817_v57 }
  0xfe   :  { %430 = vst [vmem:[#allocation9 + $0x120] sm:$0xff] %v392_v53 }
  0xff   :  { %411 = vst [vmem:[#allocation9 + $0x88] sm:$0xff] %v373_v9 }
 0x100   :  { %v597_v33 = vpop.eup %596 }
 0x101   :  { %v599_v24 = vpop.eup %598  ;;  %v345_v1 = vmul.f32 %v597_v33, %v843_v7 }
 0x102   :  { %v355_v58 = vmul.f32 %v599_v24, %v843_v7 }
 0x103   :  { %v383_v39 = vadd.f32 %v345_v1, %v821_v59 }
 0x104   :  { %v393_v60 = vadd.f32 %v355_v58, %v825_v61 }
 0x105   :  { %421 = vst [vmem:[#allocation9 + $0xd8] sm:$0xff] %v383_v39 }
 0x106   :  { %431 = vst [vmem:[#allocation9 + $0x128] sm:$0xf] %v393_v60 }
 0x107   :  { %444 = dma.vmem_to_hbm [thread:$0]  %s437_s3, 4864, %s439_s7, [#allocation6], %s679_s23, %s679_s23, %s680_s24  }
 0x108   :  { %676 = dma.done.wait [#allocation6], 4864  }
 0x109   :  { %677 = vsyncadd [#allocation6], 4294962432 }
 0x10a   :  { %449 = vsyncpa [#allocation5], 1 }
 0x10b   :  { %450 = vsyncpa [#allocation8], 1 }
 0x10c   :  { %451 = vsyncpa [#allocation6], 1 }

</bundles_post_ra>
